<compile_context>
chip_gen: v7x
topology: tpu7x:2x2x1
jax: 0.10.0
libtpu: 0.0.40
codegen_flags: <defaults>
</compile_context>

<pallas_src>
import jax
import jax.numpy as jnp
from jax.experimental import pallas as pl
from jax.experimental.pallas import tpu as pltpu

_LANES = 128
_SUBLANES = 8
_VREG_ELEMS = _LANES * _SUBLANES        # 1024 f32 elements = one (8, 128) vreg
_TILE_ROWS = 8192                       # (8192, 128) f32 tile = 4 MiB


def _linear_kernel(w_ref, b_ref, x_ref, o_ref):
    # w_ref: SMEM (1, 1) scalar; b_ref: SMEM (1,) scalar.
    # x_ref / o_ref: lane-dense VMEM slabs.
    # For a 1x1 Linear, y = x @ W.T + b is exactly a broadcast scale-and-shift.
    o_ref[...] = x_ref[...] * w_ref[0, 0] + b_ref[0]


def _row_axis_semantics():
    # v7x has 2 TensorCores sharing chip HBM bandwidth: actually split the row
    # grid across both cores. On v5e/v6e (1 TC) plain "parallel" is enough.
    try:
        kind = jax.devices()[0].device_kind.lower()
    except Exception:
        kind = ""
    if "v7" in kind:
        return (pltpu.CORE_PARALLEL,)
    return ("parallel",)


def linear_regression_forward(x, weight, bias):
    """x: (N, 1) f32; weight: (1, 1) f32; bias: (1,) f32 -> (N, 1) f32."""
    n = x.shape[0]
    dtype = x.dtype
    weight = weight.astype(dtype)
    bias = bias.astype(dtype)

    # Lane-dense slab: one pad of N up to a whole number of (8, 128) vregs.
    padded = ((n + _VREG_ELEMS - 1) // _VREG_ELEMS) * _VREG_ELEMS
    rows = padded // _LANES
    x_slab = jnp.pad(x.reshape(-1), (0, padded - n)).reshape(rows, _LANES)

    if rows <= _TILE_ROWS:
        # Small-N path (covers N=100): single block, no grid, 1 vld + 1 vst.
        out_slab = pl.pallas_call(
            _linear_kernel,
            out_shape=jax.ShapeDtypeStruct((rows, _LANES), dtype),
            in_specs=[
                pl.BlockSpec(memory_space=pltpu.MemorySpace.SMEM),
                pl.BlockSpec(memory_space=pltpu.MemorySpace.SMEM),
                pl.BlockSpec(memory_space=pltpu.MemorySpace.VMEM),
            ],
            out_specs=pl.BlockSpec(memory_space=pltpu.MemorySpace.VMEM),
        )(weight, bias, x_slab)
    else:
        # Large-N path: row-tiled grid over the (rows, 128) slab.
        #  * No second pad — the final block may be partial; Pallas masks the
        #    out-of-bounds writes of that tile.
        #  * 4 MiB tiles, double-buffered in+out = 16 MiB -> set the scoped
        #    VMEM limit to 32 MiB so it fits v5e's small default and leaves
        #    headroom under v7x's 64 MiB physical VMEM.
        #  * Alias the temporary input slab to the output buffer.
        num_tiles = pl.cdiv(rows, _TILE_ROWS)
        out_slab = pl.pallas_call(
            _linear_kernel,
            out_shape=jax.ShapeDtypeStruct((rows, _LANES), dtype),
            grid=(num_tiles,),
            in_specs=[
                pl.BlockSpec(memory_space=pltpu.MemorySpace.SMEM),
                pl.BlockSpec(memory_space=pltpu.MemorySpace.SMEM),
                pl.BlockSpec((_TILE_ROWS, _LANES), lambda i: (i, 0)),
            ],
            out_specs=pl.BlockSpec((_TILE_ROWS, _LANES), lambda i: (i, 0)),
            input_output_aliases={2: 0},
            compiler_params=pltpu.CompilerParams(
                dimension_semantics=_row_axis_semantics(),
                vmem_limit_bytes=32 << 20,
            ),
        )(weight, bias, x_slab)
        # TODO(synk): if xprof still shows exposed DMA on v7x after the tile
        # growth, sweep pipeline_mode=pl.Buffered(3) on the row-tiled specs.

    if padded == n:
        # No padding was added: plain reshape, no slice copy.
        return out_slab.reshape(n, 1)
    return out_slab.reshape(-1)[:n].reshape(n, 1)


if __name__ == "__main__":
    key = jax.random.PRNGKey(0)
    k_w, k_b = jax.random.split(key)

    # Input matching the module's usage: x = linspace(-1, 1, 100) unsqueezed
    # to a (100, 1) column vector.
    x = jnp.linspace(-1.0, 1.0, 100, dtype=jnp.float32).reshape(100, 1)

    # Deterministic parameter init mimicking nn.Linear(1, 1):
    # PyTorch default init is U(-1/sqrt(in_features), 1/sqrt(in_features)) = U(-1, 1).
    weight = jax.random.uniform(k_w, (1, 1), jnp.float32, minval=-1.0, maxval=1.0)
    bias = jax.random.uniform(k_b, (1,), jnp.float32, minval=-1.0, maxval=1.0)

    out = linear_regression_forward(x, weight, bias)
    out = jax.block_until_ready(out)

    # Pure-JAX reference check.
    ref = x @ weight.T + bias
    assert out.shape == (100, 1)
    assert jnp.allclose(out, ref, atol=1e-6), "mismatch vs reference"

    print("KERNEL_OK")
</pallas_src>

<mosaic_0001>
module attributes {stable_mosaic.version = 11 : i64} {
  func.func @_linear_kernel(%arg0: memref<1x1xf32, #tpu.memory_space<smem>>, %arg1: memref<1xf32, #tpu.memory_space<smem>>, %arg2: memref<8x128xf32, #tpu.memory_space<vmem>>, %arg3: memref<8x128xf32, #tpu.memory_space<vmem>>) attributes {dimension_semantics = [], scalar_prefetch = 0 : i64, scratch_operands = 0 : i64, tpu.core_type = #tpu.core_type<tc>} {
    %c0 = arith.constant 0 : index
    %c0_0 = arith.constant 0 : index
    %0 = vector.load %arg2[%c0, %c0_0] : memref<8x128xf32, #tpu.memory_space<vmem>>, vector<8x128xf32>
    %c0_1 = arith.constant 0 : index
    %c0_2 = arith.constant 0 : index
    %1 = memref.load %arg0[%c0_1, %c0_2] : memref<1x1xf32, #tpu.memory_space<smem>>
    %2 = vector.broadcast %1 : f32 to vector<8x128xf32>
    %3 = arith.mulf %0, %2 : vector<8x128xf32>
    %c0_3 = arith.constant 0 : index
    %4 = memref.load %arg1[%c0_3] : memref<1xf32, #tpu.memory_space<smem>>
    %5 = vector.broadcast %4 : f32 to vector<8x128xf32>
    %6 = arith.addf %3, %5 : vector<8x128xf32>
    %c0_4 = arith.constant 0 : index
    %c0_5 = arith.constant 0 : index
    %7 = vector.load %arg3[%c0_4, %c0_5] : memref<8x128xf32, #tpu.memory_space<vmem>>, vector<8x128xf32>
    tpu.vector_store %arg3[%c0_4, %c0_5], %6 {strides = array<i32>} : memref<8x128xf32, #tpu.memory_space<vmem>>, vector<8x128xf32>,
    return
  }
}

</mosaic_0001>

<bundles_post_ra>
// kernel: tpu_custom_call.1
= control target key start
LH: loop header
LB: loop body
LE: loop exit
PB: predicated region body
PF: predicated region fallthrough
CT: control target
= control target key end

     0   :  { %10 = vsyncpa [#allocation5], 0  ;;  %s154_s0 = inlined_call_operand.<no memory space> [shape: f32[1,1], index: 0, kind: input, shape index: {}]   ;;  %s155_s1 = inlined_call_operand.<no memory space> [shape: f32[1], index: 1, kind: input, shape index: {}]   ;;  %s156_s2 = inlined_call_operand.hbm [shape: f32[8,128], index: 2, kind: input, shape index: {}]   ;;  %s157_s3 = inlined_call_operand.hbm [shape: f32[8,128], index: 3, kind: output, shape index: {}]  }
   0x1   :  { %11 = vsyncpa [#allocation6], 0  ;;  %s102_s12 = smov [#allocation4]   ;;  %s54_s16 = scalar_lea.hbm %s156_s2, 128 }
   0x2   :  { %s22_s13 = sshll.u32 %s102_s12, 4  ;;  %p55_p0 = scmp.ne.s32.totalorder %s156_s2, %s54_s16  ;;  %s23_s13 = int_to_ptr.vmem [resolvable:$true] %s22_s13 }
   0x3   :  { %p58_p1 = scmp.lt.u32.totalorder %s54_s16, %s156_s2 }
   0x5   :  { %p60_p2 = pnand %p58_p1, %p55_p0 }
   0x7   :  { %63 = shalt.err (!%p60_p2)
}
   0x8   :  { %s64_s21 = scalar_lea.vmem %s23_s13, 128  ;;  %p69_p4 = scmp.lt.s32.totalorder %s23_s13, %s23_s13 }
   0x9   :  { %p65_p3 = scmp.ne.s32.totalorder %s23_s13, %s64_s21  ;;  %p70_p5 = scmp.lt.s32.totalorder %s64_s21, %s64_s21 }
   0xb   :  { %p71_p6 = por %p70_p5, %p69_p4 }
   0xd   :  { %p72_p7 = pnand %p71_p6, %p65_p3 }
   0xf   :  { %75 = shalt.err (!%p72_p7)
}
  0x10   :  { %25 = dma.hbm_to_vmem [thread:$0]  %s156_s2, 128, %s23_s13, [#allocation5]  }
  0x11   :  { %98 = dma.done.wait [#allocation5], 128  }
  0x12   :  { %99 = vsyncadd [#allocation5], 4294967168  ;;  %v31_v0 = vstv %s154_s0  ;;  %v29_v1 = vld [vmem:[#allocation4] sm:$0xff]  ;;  %v34_v2 = vstv %s155_s1  ;;  %s103_s28 = smov [#allocation7]  }
  0x13   :  { %s43_s29 = sshll.u32 %s103_s28, 4  ;;  %v32_v3 = vmul.f32 %v31_v0, %v29_v1  ;;  %s44_s29 = int_to_ptr.vmem [resolvable:$true] %s43_s29 }
  0x14   :  { %s76_s30 = scalar_lea.vmem %s44_s29, 128  ;;  %p81_p9 = scmp.lt.s32.totalorder %s44_s29, %s44_s29 }
  0x15   :  { %v35_v4 = vadd.f32 %v34_v2, %v32_v3  ;;  %p77_p8 = scmp.ne.s32.totalorder %s44_s29, %s76_s30  ;;  %p82_p10 = scmp.lt.s32.totalorder %s76_s30, %s76_s30 }
  0x17   :  { %36 = vst [vmem:[#allocation7] sm:$0xff] %v35_v4  ;;  %p83_p11 = por %p82_p10, %p81_p9 }
  0x19   :  { %p84_p12 = pnand %p83_p11, %p77_p8 }
  0x1b   :  { %87 = shalt.err (!%p84_p12)
}
  0x1c   :  { %s88_s4 = scalar_lea.hbm %s157_s3, 128 }
  0x1d   :  { %p89_p13 = scmp.ne.s32.totalorder %s157_s3, %s88_s4  ;;  %p92_p0 = scmp.lt.u32.totalorder %s88_s4, %s157_s3 }
  0x1f   :  { %p94_p1 = pnand %p92_p0, %p89_p13 }
  0x21   :  { %97 = shalt.err (!%p94_p1)
}
  0x22   :  { %46 = dma.vmem_to_hbm [thread:$0]  %s44_s29, 128, %s157_s3, [#allocation6]  }
  0x23   :  { %100 = dma.done.wait [#allocation6], 128  }
  0x24   :  { %101 = vsyncadd [#allocation6], 4294967168 }
  0x25   :  { %50 = vsyncpa [#allocation5], 1 }
  0x26   :  { %51 = vsyncpa [#allocation6], 1 }

</bundles_post_ra>
